<compile_context>
chip_gen: v6e
topology: v6e:2x2x1
jax: 0.10.0
libtpu: 0.0.40
codegen_flags: <defaults>
</compile_context>

<pallas_src>
import numpy as np
import jax
import jax.numpy as jnp
from jax import lax
from jax.experimental import pallas as pl
from jax.experimental.pallas import tpu as pltpu


# ----------------------------------------------------------------------------
# Tap construction (mirrors AntiAliasInterpolation2d.__init__, but separable)
# ----------------------------------------------------------------------------
def make_gaussian_taps(scale):
    """Normalized 1-D Gaussian taps and kernel size (host-side, deterministic)."""
    sigma = (1.0 / scale - 1.0) / 2.0
    k = 2 * round(sigma * 4) + 1
    mean = (k - 1) / 2.0
    coords = np.arange(k, dtype=np.float64)
    g = np.exp(-((coords - mean) ** 2) / (2.0 * sigma ** 2))
    g = g / g.sum()
    return g, k


def make_separable_matrices(H, W, scale):
    """Banded matrices V (H_out, H), Hm (W, W_out) such that
    V @ x[c] @ Hm == subsample_s(depthwise_gauss_conv(zero_pad(x[c])))."""
    g, k = make_gaussian_taps(scale)
    ka = k // 2
    s = int(1.0 / scale)                       # int_inv_scale
    H_out = -(-H // s)                         # == len(range(0, H, s))
    W_out = -(-W // s)
    V = np.zeros((H_out, H), dtype=np.float64)
    for r in range(H_out):
        for ky in range(k):
            i = r * s + ky - ka
            if 0 <= i < H:
                V[r, i] = g[ky]
    Hm = np.zeros((W, W_out), dtype=np.float64)
    for q in range(W_out):
        for kx in range(k):
            j = q * s + kx - ka
            if 0 <= j < W:
                Hm[j, q] = g[kx]
    return jnp.asarray(V, dtype=jnp.float32), jnp.asarray(Hm, dtype=jnp.float32)


# ----------------------------------------------------------------------------
# Pallas kernel: all scales of one batch element, two MXU matmuls per channel
# ----------------------------------------------------------------------------
def _make_pyramid_kernel(C, num_scales):
    def kernel(x_ref, *refs):
        # refs = (V_0, Hm_0, V_1, Hm_1, ..., out_0, out_1, ...)
        mat_refs = refs[:2 * num_scales]
        out_refs = refs[2 * num_scales:]
        for si in range(num_scales):
            V = mat_refs[2 * si][...].astype(jnp.float32)      # (H_out, H)
            Hm = mat_refs[2 * si + 1][...].astype(jnp.float32)  # (W, W_out)
            o_ref = out_refs[si]                                # (1, C, H_out, W_out)
            for c in range(C):
                xc = x_ref[0, c].astype(jnp.float32)            # (H, W)
                t = jnp.dot(V, xc, preferred_element_type=jnp.float32)    # (H_out, W)
                oc = jnp.dot(t, Hm, preferred_element_type=jnp.float32)   # (H_out, W_out)
                o_ref[0, c] = oc.astype(o_ref.dtype)
    return kernel


def image_pyramid_downsample(x, mats):
    """mats: list of (scale, V, Hm). Returns one downsampled array per entry."""
    N, C, H, W = x.shape
    num_scales = len(mats)

    in_specs = [pl.BlockSpec((1, C, H, W), lambda n: (n, 0, 0, 0))]
    args = [x]
    out_shapes = []
    out_specs = []
    for (_, V, Hm) in mats:
        H_out, W_out = int(V.shape[0]), int(Hm.shape[1])
        in_specs.append(pl.BlockSpec(tuple(V.shape), lambda n: (0, 0)))
        in_specs.append(pl.BlockSpec(tuple(Hm.shape), lambda n: (0, 0)))
        args.append(V)
        args.append(Hm)
        out_shapes.append(jax.ShapeDtypeStruct((N, C, H_out, W_out), x.dtype))
        out_specs.append(pl.BlockSpec((1, C, H_out, W_out), lambda n: (n, 0, 0, 0)))

    outs = pl.pallas_call(
        _make_pyramid_kernel(C, num_scales),
        out_shape=tuple(out_shapes),
        grid=(N,),
        in_specs=in_specs,
        out_specs=tuple(out_specs),
        compiler_params=pltpu.CompilerParams(
            dimension_semantics=("parallel",)),
    )(*args)
    return outs


# ----------------------------------------------------------------------------
# ImagePyramide
# ----------------------------------------------------------------------------
class ImagePyramide:
    """Create image pyramid for pyramid perceptual loss (Pallas TPU version)."""

    def __init__(self, scales, num_channels):
        self.scales = list(scales)
        self.num_channels = num_channels
        self._mat_cache = {}   # (H, W) -> [(scale, V, Hm), ...] for non-unit scales

    def _get_mats(self, H, W):
        key = (H, W)
        if key not in self._mat_cache:
            mats = []
            for scale in self.scales:
                if float(scale) == 1.0:
                    continue
                V, Hm = make_separable_matrices(H, W, scale)
                mats.append((scale, V, Hm))
            self._mat_cache[key] = mats
        return self._mat_cache[key]

    def __call__(self, x):
        N, C, H, W = x.shape
        out_dict = {}
        has_downsample = False
        for scale in self.scales:
            if float(scale) == 1.0:
                out_dict['prediction_' + str(scale)] = x
            else:
                has_downsample = True
        if has_downsample:
            mats = self._get_mats(H, W)
            outs = image_pyramid_downsample(x, mats)
            for (scale, _, _), o in zip(mats, outs):
                out_dict['prediction_' + str(scale)] = o
        return out_dict


# ----------------------------------------------------------------------------
# Pure-JAX reference for verification (direct depthwise conv formulation)
# ----------------------------------------------------------------------------
def make_gaussian_weight(num_channels, scale):
    sigma = (1.0 / scale - 1.0) / 2.0
    kernel_size = 2 * round(sigma * 4) + 1
    mean = (kernel_size - 1) / 2.0
    coords = jnp.arange(kernel_size, dtype=jnp.float32)
    g = jnp.exp(-((coords - mean) ** 2) / (2.0 * sigma ** 2))
    kernel2d = g[:, None] * g[None, :]
    kernel2d = kernel2d / jnp.sum(kernel2d)
    return jnp.broadcast_to(kernel2d[None, None, :, :],
                            (num_channels, 1, kernel_size, kernel_size)).astype(jnp.float32)


def _reference_downsample(x, scale):
    if float(scale) == 1.0:
        return x
    C = x.shape[1]
    weight = make_gaussian_weight(C, scale)
    k = weight.shape[-1]
    ka = k // 2
    x_pad = jnp.pad(x, ((0, 0), (0, 0), (ka, ka), (ka, ka)))
    out = lax.conv_general_dilated(
        x_pad, weight, window_strides=(1, 1), padding='VALID',
        dimension_numbers=('NCHW', 'OIHW', 'NCHW'), feature_group_count=C)
    s = int(1.0 / scale)
    return out[:, :, ::s, ::s]


if __name__ == "__main__":
    key = jax.random.PRNGKey(0)
    N, C, H, W = 2, 4, 16, 16
    scales = [1, 0.5, 0.25]

    x = jax.random.normal(key, (N, C, H, W), dtype=jnp.float32)

    pyramid = ImagePyramide(scales, num_channels=C)
    out = pyramid(x)
    out = jax.tree_util.tree_map(jax.block_until_ready, out)

    ok = True
    for scale in scales:
        key_name = 'prediction_' + str(scale)
        ref = _reference_downsample(x, scale)
        got = out[key_name]
        if got.shape != ref.shape:
            ok = False
            break
        if not bool(jnp.allclose(got, ref, atol=1e-4, rtol=1e-4)):
            ok = False
            break

    print("KERNEL_OK" if ok else "MISMATCH")
</pallas_src>

<mosaic_0001>
module attributes {stable_mosaic.version = 11 : i64} {
  func.func @kernel(%arg0: i32, %arg1: memref<1x4x16x16xf32, #tpu.memory_space<vmem>>, %arg2: memref<8x16xf32, #tpu.memory_space<vmem>>, %arg3: memref<16x8xf32, #tpu.memory_space<vmem>>, %arg4: memref<4x16xf32, #tpu.memory_space<vmem>>, %arg5: memref<16x4xf32, #tpu.memory_space<vmem>>, %arg6: memref<1x4x8x8xf32, #tpu.memory_space<vmem>>, %arg7: memref<1x4x4x4xf32, #tpu.memory_space<vmem>>) attributes {dimension_semantics = [#tpu.dimension_semantics<parallel>], iteration_bounds = array<i64: 2>, scalar_prefetch = 0 : i64, scratch_operands = 0 : i64, tpu.core_type = #tpu.core_type<tc>, window_params = [{transform_indices = @transform_0, window_bounds = array<i64: 1, 4, 16, 16>}, {pipeline_mode = #tpu.pipeline_mode<synchronous>, transform_indices = @transform_1, window_bounds = array<i64: 8, 16>}, {pipeline_mode = #tpu.pipeline_mode<synchronous>, transform_indices = @transform_2, window_bounds = array<i64: 16, 8>}, {pipeline_mode = #tpu.pipeline_mode<synchronous>, transform_indices = @transform_3, window_bounds = array<i64: 4, 16>}, {pipeline_mode = #tpu.pipeline_mode<synchronous>, transform_indices = @transform_4, window_bounds = array<i64: 16, 4>}, {transform_indices = @transform_5, window_bounds = array<i64: 1, 4, 8, 8>}, {transform_indices = @transform_6, window_bounds = array<i64: 1, 4, 4, 4>}]} {
    %c0 = arith.constant 0 : index
    %c0_0 = arith.constant 0 : index
    %0 = vector.load %arg2[%c0, %c0_0] : memref<8x16xf32, #tpu.memory_space<vmem>>, vector<8x16xf32>
    %c0_1 = arith.constant 0 : index
    %c0_2 = arith.constant 0 : index
    %1 = vector.load %arg3[%c0_1, %c0_2] : memref<16x8xf32, #tpu.memory_space<vmem>>, vector<16x8xf32>
    %c0_3 = arith.constant 0 : index
    %c0_4 = arith.constant 0 : index
    %c0_5 = arith.constant 0 : index
    %c0_6 = arith.constant 0 : index
    %2 = vector.load %arg1[%c0_3, %c0_4, %c0_5, %c0_6] : memref<1x4x16x16xf32, #tpu.memory_space<vmem>>, vector<1x1x16x16xf32>
    %3 = vector.shape_cast %2 : vector<1x1x16x16xf32> to vector<16x16xf32>
    %cst = arith.constant dense<0.000000e+00> : vector<8x16xf32>
    %4 = tpu.matmul %0, %3, %cst {dimension_numbers = #tpu.dot_dimension_numbers<[1], [0], [0], [1], [0, 0, 1, 1], [], []>} : vector<8x16xf32>, vector<16x16xf32>, vector<8x16xf32> -> vector<8x16xf32>
    %cst_7 = arith.constant dense<0.000000e+00> : vector<8x8xf32>
    %5 = tpu.matmul %4, %1, %cst_7 {dimension_numbers = #tpu.dot_dimension_numbers<[1], [0], [0], [1], [0, 0, 1, 1], [], []>} : vector<8x16xf32>, vector<16x8xf32>, vector<8x8xf32> -> vector<8x8xf32>
    %c0_8 = arith.constant 0 : index
    %c0_9 = arith.constant 0 : index
    %c0_10 = arith.constant 0 : index
    %c0_11 = arith.constant 0 : index
    %6 = vector.load %arg6[%c0_8, %c0_9, %c0_10, %c0_11] : memref<1x4x8x8xf32, #tpu.memory_space<vmem>>, vector<1x1x8x8xf32>
    %7 = vector.shape_cast %6 : vector<1x1x8x8xf32> to vector<8x8xf32>
    %8 = vector.shape_cast %5 : vector<8x8xf32> to vector<1x1x8x8xf32>
    tpu.vector_store %arg6[%c0_8, %c0_9, %c0_10, %c0_11], %8 {strides = array<i32>} : memref<1x4x8x8xf32, #tpu.memory_space<vmem>>, vector<1x1x8x8xf32>,
    %c0_12 = arith.constant 0 : index
    %c1 = arith.constant 1 : index
    %c0_13 = arith.constant 0 : index
    %c0_14 = arith.constant 0 : index
    %9 = vector.load %arg1[%c0_12, %c1, %c0_13, %c0_14] : memref<1x4x16x16xf32, #tpu.memory_space<vmem>>, vector<1x1x16x16xf32>
    %10 = vector.shape_cast %9 : vector<1x1x16x16xf32> to vector<16x16xf32>
    %cst_15 = arith.constant dense<0.000000e+00> : vector<8x16xf32>
    %11 = tpu.matmul %0, %10, %cst_15 {dimension_numbers = #tpu.dot_dimension_numbers<[1], [0], [0], [1], [0, 0, 1, 1], [], []>} : vector<8x16xf32>, vector<16x16xf32>, vector<8x16xf32> -> vector<8x16xf32>
    %cst_16 = arith.constant dense<0.000000e+00> : vector<8x8xf32>
    %12 = tpu.matmul %11, %1, %cst_16 {dimension_numbers = #tpu.dot_dimension_numbers<[1], [0], [0], [1], [0, 0, 1, 1], [], []>} : vector<8x16xf32>, vector<16x8xf32>, vector<8x8xf32> -> vector<8x8xf32>
    %c0_17 = arith.constant 0 : index
    %c1_18 = arith.constant 1 : index
    %c0_19 = arith.constant 0 : index
    %c0_20 = arith.constant 0 : index
    %13 = vector.load %arg6[%c0_17, %c1_18, %c0_19, %c0_20] : memref<1x4x8x8xf32, #tpu.memory_space<vmem>>, vector<1x1x8x8xf32>
    %14 = vector.shape_cast %13 : vector<1x1x8x8xf32> to vector<8x8xf32>
    %15 = vector.shape_cast %12 : vector<8x8xf32> to vector<1x1x8x8xf32>
    tpu.vector_store %arg6[%c0_17, %c1_18, %c0_19, %c0_20], %15 {strides = array<i32>} : memref<1x4x8x8xf32, #tpu.memory_space<vmem>>, vector<1x1x8x8xf32>,
    %c0_21 = arith.constant 0 : index
    %c2 = arith.constant 2 : index
    %c0_22 = arith.constant 0 : index
    %c0_23 = arith.constant 0 : index
    %16 = vector.load %arg1[%c0_21, %c2, %c0_22, %c0_23] : memref<1x4x16x16xf32, #tpu.memory_space<vmem>>, vector<1x1x16x16xf32>
    %17 = vector.shape_cast %16 : vector<1x1x16x16xf32> to vector<16x16xf32>
    %cst_24 = arith.constant dense<0.000000e+00> : vector<8x16xf32>
    %18 = tpu.matmul %0, %17, %cst_24 {dimension_numbers = #tpu.dot_dimension_numbers<[1], [0], [0], [1], [0, 0, 1, 1], [], []>} : vector<8x16xf32>, vector<16x16xf32>, vector<8x16xf32> -> vector<8x16xf32>
    %cst_25 = arith.constant dense<0.000000e+00> : vector<8x8xf32>
    %19 = tpu.matmul %18, %1, %cst_25 {dimension_numbers = #tpu.dot_dimension_numbers<[1], [0], [0], [1], [0, 0, 1, 1], [], []>} : vector<8x16xf32>, vector<16x8xf32>, vector<8x8xf32> -> vector<8x8xf32>
    %c0_26 = arith.constant 0 : index
    %c2_27 = arith.constant 2 : index
    %c0_28 = arith.constant 0 : index
    %c0_29 = arith.constant 0 : index
    %20 = vector.load %arg6[%c0_26, %c2_27, %c0_28, %c0_29] : memref<1x4x8x8xf32, #tpu.memory_space<vmem>>, vector<1x1x8x8xf32>
    %21 = vector.shape_cast %20 : vector<1x1x8x8xf32> to vector<8x8xf32>
    %22 = vector.shape_cast %19 : vector<8x8xf32> to vector<1x1x8x8xf32>
    tpu.vector_store %arg6[%c0_26, %c2_27, %c0_28, %c0_29], %22 {strides = array<i32>} : memref<1x4x8x8xf32, #tpu.memory_space<vmem>>, vector<1x1x8x8xf32>,
    %c0_30 = arith.constant 0 : index
    %c3 = arith.constant 3 : index
    %c0_31 = arith.constant 0 : index
    %c0_32 = arith.constant 0 : index
    %23 = vector.load %arg1[%c0_30, %c3, %c0_31, %c0_32] : memref<1x4x16x16xf32, #tpu.memory_space<vmem>>, vector<1x1x16x16xf32>
    %24 = vector.shape_cast %23 : vector<1x1x16x16xf32> to vector<16x16xf32>
    %cst_33 = arith.constant dense<0.000000e+00> : vector<8x16xf32>
    %25 = tpu.matmul %0, %24, %cst_33 {dimension_numbers = #tpu.dot_dimension_numbers<[1], [0], [0], [1], [0, 0, 1, 1], [], []>} : vector<8x16xf32>, vector<16x16xf32>, vector<8x16xf32> -> vector<8x16xf32>
    %cst_34 = arith.constant dense<0.000000e+00> : vector<8x8xf32>
    %26 = tpu.matmul %25, %1, %cst_34 {dimension_numbers = #tpu.dot_dimension_numbers<[1], [0], [0], [1], [0, 0, 1, 1], [], []>} : vector<8x16xf32>, vector<16x8xf32>, vector<8x8xf32> -> vector<8x8xf32>
    %c0_35 = arith.constant 0 : index
    %c3_36 = arith.constant 3 : index
    %c0_37 = arith.constant 0 : index
    %c0_38 = arith.constant 0 : index
    %27 = vector.load %arg6[%c0_35, %c3_36, %c0_37, %c0_38] : memref<1x4x8x8xf32, #tpu.memory_space<vmem>>, vector<1x1x8x8xf32>
    %28 = vector.shape_cast %27 : vector<1x1x8x8xf32> to vector<8x8xf32>
    %29 = vector.shape_cast %26 : vector<8x8xf32> to vector<1x1x8x8xf32>
    tpu.vector_store %arg6[%c0_35, %c3_36, %c0_37, %c0_38], %29 {strides = array<i32>} : memref<1x4x8x8xf32, #tpu.memory_space<vmem>>, vector<1x1x8x8xf32>,
    %c0_39 = arith.constant 0 : index
    %c0_40 = arith.constant 0 : index
    %30 = vector.load %arg4[%c0_39, %c0_40] : memref<4x16xf32, #tpu.memory_space<vmem>>, vector<4x16xf32>
    %c0_41 = arith.constant 0 : index
    %c0_42 = arith.constant 0 : index
    %31 = vector.load %arg5[%c0_41, %c0_42] : memref<16x4xf32, #tpu.memory_space<vmem>>, vector<16x4xf32>
    %c0_43 = arith.constant 0 : index
    %c0_44 = arith.constant 0 : index
    %c0_45 = arith.constant 0 : index
    %c0_46 = arith.constant 0 : index
    %32 = vector.load %arg1[%c0_43, %c0_44, %c0_45, %c0_46] : memref<1x4x16x16xf32, #tpu.memory_space<vmem>>, vector<1x1x16x16xf32>
    %33 = vector.shape_cast %32 : vector<1x1x16x16xf32> to vector<16x16xf32>
    %cst_47 = arith.constant dense<0.000000e+00> : vector<4x16xf32>
    %34 = tpu.matmul %30, %33, %cst_47 {dimension_numbers = #tpu.dot_dimension_numbers<[1], [0], [0], [1], [0, 0, 1, 1], [], []>} : vector<4x16xf32>, vector<16x16xf32>, vector<4x16xf32> -> vector<4x16xf32>
    %cst_48 = arith.constant dense<0.000000e+00> : vector<4x4xf32>
    %35 = tpu.matmul %34, %31, %cst_48 {dimension_numbers = #tpu.dot_dimension_numbers<[1], [0], [0], [1], [0, 0, 1, 1], [], []>} : vector<4x16xf32>, vector<16x4xf32>, vector<4x4xf32> -> vector<4x4xf32>
    %c0_49 = arith.constant 0 : index
    %c0_50 = arith.constant 0 : index
    %c0_51 = arith.constant 0 : index
    %c0_52 = arith.constant 0 : index
    %36 = vector.load %arg7[%c0_49, %c0_50, %c0_51, %c0_52] : memref<1x4x4x4xf32, #tpu.memory_space<vmem>>, vector<1x1x4x4xf32>
    %37 = vector.shape_cast %36 : vector<1x1x4x4xf32> to vector<4x4xf32>
    %38 = vector.shape_cast %35 : vector<4x4xf32> to vector<1x1x4x4xf32>
    tpu.vector_store %arg7[%c0_49, %c0_50, %c0_51, %c0_52], %38 {strides = array<i32>} : memref<1x4x4x4xf32, #tpu.memory_space<vmem>>, vector<1x1x4x4xf32>,
    %c0_53 = arith.constant 0 : index
    %c1_54 = arith.constant 1 : index
    %c0_55 = arith.constant 0 : index
    %c0_56 = arith.constant 0 : index
    %39 = vector.load %arg1[%c0_53, %c1_54, %c0_55, %c0_56] : memref<1x4x16x16xf32, #tpu.memory_space<vmem>>, vector<1x1x16x16xf32>
    %40 = vector.shape_cast %39 : vector<1x1x16x16xf32> to vector<16x16xf32>
    %cst_57 = arith.constant dense<0.000000e+00> : vector<4x16xf32>
    %41 = tpu.matmul %30, %40, %cst_57 {dimension_numbers = #tpu.dot_dimension_numbers<[1], [0], [0], [1], [0, 0, 1, 1], [], []>} : vector<4x16xf32>, vector<16x16xf32>, vector<4x16xf32> -> vector<4x16xf32>
    %cst_58 = arith.constant dense<0.000000e+00> : vector<4x4xf32>
    %42 = tpu.matmul %41, %31, %cst_58 {dimension_numbers = #tpu.dot_dimension_numbers<[1], [0], [0], [1], [0, 0, 1, 1], [], []>} : vector<4x16xf32>, vector<16x4xf32>, vector<4x4xf32> -> vector<4x4xf32>
    %c0_59 = arith.constant 0 : index
    %c1_60 = arith.constant 1 : index
    %c0_61 = arith.constant 0 : index
    %c0_62 = arith.constant 0 : index
    %43 = vector.load %arg7[%c0_59, %c1_60, %c0_61, %c0_62] : memref<1x4x4x4xf32, #tpu.memory_space<vmem>>, vector<1x1x4x4xf32>
    %44 = vector.shape_cast %43 : vector<1x1x4x4xf32> to vector<4x4xf32>
    %45 = vector.shape_cast %42 : vector<4x4xf32> to vector<1x1x4x4xf32>
    tpu.vector_store %arg7[%c0_59, %c1_60, %c0_61, %c0_62], %45 {strides = array<i32>} : memref<1x4x4x4xf32, #tpu.memory_space<vmem>>, vector<1x1x4x4xf32>,
    %c0_63 = arith.constant 0 : index
    %c2_64 = arith.constant 2 : index
    %c0_65 = arith.constant 0 : index
    %c0_66 = arith.constant 0 : index
    %46 = vector.load %arg1[%c0_63, %c2_64, %c0_65, %c0_66] : memref<1x4x16x16xf32, #tpu.memory_space<vmem>>, vector<1x1x16x16xf32>
    %47 = vector.shape_cast %46 : vector<1x1x16x16xf32> to vector<16x16xf32>
    %cst_67 = arith.constant dense<0.000000e+00> : vector<4x16xf32>
    %48 = tpu.matmul %30, %47, %cst_67 {dimension_numbers = #tpu.dot_dimension_numbers<[1], [0], [0], [1], [0, 0, 1, 1], [], []>} : vector<4x16xf32>, vector<16x16xf32>, vector<4x16xf32> -> vector<4x16xf32>
    %cst_68 = arith.constant dense<0.000000e+00> : vector<4x4xf32>
    %49 = tpu.matmul %48, %31, %cst_68 {dimension_numbers = #tpu.dot_dimension_numbers<[1], [0], [0], [1], [0, 0, 1, 1], [], []>} : vector<4x16xf32>, vector<16x4xf32>, vector<4x4xf32> -> vector<4x4xf32>
    %c0_69 = arith.constant 0 : index
    %c2_70 = arith.constant 2 : index
    %c0_71 = arith.constant 0 : index
    %c0_72 = arith.constant 0 : index
    %50 = vector.load %arg7[%c0_69, %c2_70, %c0_71, %c0_72] : memref<1x4x4x4xf32, #tpu.memory_space<vmem>>, vector<1x1x4x4xf32>
    %51 = vector.shape_cast %50 : vector<1x1x4x4xf32> to vector<4x4xf32>
    %52 = vector.shape_cast %49 : vector<4x4xf32> to vector<1x1x4x4xf32>
    tpu.vector_store %arg7[%c0_69, %c2_70, %c0_71, %c0_72], %52 {strides = array<i32>} : memref<1x4x4x4xf32, #tpu.memory_space<vmem>>, vector<1x1x4x4xf32>,
    %c0_73 = arith.constant 0 : index
    %c3_74 = arith.constant 3 : index
    %c0_75 = arith.constant 0 : index
    %c0_76 = arith.constant 0 : index
    %53 = vector.load %arg1[%c0_73, %c3_74, %c0_75, %c0_76] : memref<1x4x16x16xf32, #tpu.memory_space<vmem>>, vector<1x1x16x16xf32>
    %54 = vector.shape_cast %53 : vector<1x1x16x16xf32> to vector<16x16xf32>
    %cst_77 = arith.constant dense<0.000000e+00> : vector<4x16xf32>
    %55 = tpu.matmul %30, %54, %cst_77 {dimension_numbers = #tpu.dot_dimension_numbers<[1], [0], [0], [1], [0, 0, 1, 1], [], []>} : vector<4x16xf32>, vector<16x16xf32>, vector<4x16xf32> -> vector<4x16xf32>
    %cst_78 = arith.constant dense<0.000000e+00> : vector<4x4xf32>
    %56 = tpu.matmul %55, %31, %cst_78 {dimension_numbers = #tpu.dot_dimension_numbers<[1], [0], [0], [1], [0, 0, 1, 1], [], []>} : vector<4x16xf32>, vector<16x4xf32>, vector<4x4xf32> -> vector<4x4xf32>
    %c0_79 = arith.constant 0 : index
    %c3_80 = arith.constant 3 : index
    %c0_81 = arith.constant 0 : index
    %c0_82 = arith.constant 0 : index
    %57 = vector.load %arg7[%c0_79, %c3_80, %c0_81, %c0_82] : memref<1x4x4x4xf32, #tpu.memory_space<vmem>>, vector<1x1x4x4xf32>
    %58 = vector.shape_cast %57 : vector<1x1x4x4xf32> to vector<4x4xf32>
    %59 = vector.shape_cast %56 : vector<4x4xf32> to vector<1x1x4x4xf32>
    tpu.vector_store %arg7[%c0_79, %c3_80, %c0_81, %c0_82], %59 {strides = array<i32>} : memref<1x4x4x4xf32, #tpu.memory_space<vmem>>, vector<1x1x4x4xf32>,
    return
  }
  func.func @transform_0(%arg0: i32) -> (i32, i32, i32, i32) {
    %c0_i32 = arith.constant 0 : i32
    %c0_i32_0 = arith.constant 0 : i32
    %c0_i32_1 = arith.constant 0 : i32
    %c0_i32_2 = arith.constant 0 : i32
    return %arg0, %c0_i32, %c0_i32_0, %c0_i32_1 : i32, i32, i32, i32
  }
  func.func @transform_1(%arg0: i32) -> (i32, i32) {
    %c0_i32 = arith.constant 0 : i32
    %c0_i32_0 = arith.constant 0 : i32
    %c0_i32_1 = arith.constant 0 : i32
    return %c0_i32, %c0_i32_0 : i32, i32
  }
  func.func @transform_2(%arg0: i32) -> (i32, i32) {
    %c0_i32 = arith.constant 0 : i32
    %c0_i32_0 = arith.constant 0 : i32
    %c0_i32_1 = arith.constant 0 : i32
    return %c0_i32, %c0_i32_0 : i32, i32
  }
  func.func @transform_3(%arg0: i32) -> (i32, i32) {
    %c0_i32 = arith.constant 0 : i32
    %c0_i32_0 = arith.constant 0 : i32
    %c0_i32_1 = arith.constant 0 : i32
    return %c0_i32, %c0_i32_0 : i32, i32
  }
  func.func @transform_4(%arg0: i32) -> (i32, i32) {
    %c0_i32 = arith.constant 0 : i32
    %c0_i32_0 = arith.constant 0 : i32
    %c0_i32_1 = arith.constant 0 : i32
    return %c0_i32, %c0_i32_0 : i32, i32
  }
  func.func @transform_5(%arg0: i32) -> (i32, i32, i32, i32) {
    %c0_i32 = arith.constant 0 : i32
    %c0_i32_0 = arith.constant 0 : i32
    %c0_i32_1 = arith.constant 0 : i32
    %c0_i32_2 = arith.constant 0 : i32
    return %arg0, %c0_i32, %c0_i32_0, %c0_i32_1 : i32, i32, i32, i32
  }
  func.func @transform_6(%arg0: i32) -> (i32, i32, i32, i32) {
    %c0_i32 = arith.constant 0 : i32
    %c0_i32_0 = arith.constant 0 : i32
    %c0_i32_1 = arith.constant 0 : i32
    %c0_i32_2 = arith.constant 0 : i32
    return %arg0, %c0_i32, %c0_i32_0, %c0_i32_1 : i32, i32, i32, i32
  }
}

</mosaic_0001>

<bundles_post_ra>
// kernel: tpu_custom_call.1
= control target key start
LH: loop header
LB: loop body
LE: loop exit
PB: predicated region body
PF: predicated region fallthrough
CT: control target
= control target key end

     0   :  { %12 = vsyncpa [#allocation3], 0  ;;  %s2368_s0 = inlined_call_operand.hbm [shape: f32[2,4,16,16], index: 0, kind: input, shape index: {}]   ;;  %s2369_s1 = inlined_call_operand.vmem [shape: f32[8,16], index: 1, kind: input, shape index: {}]   ;;  %s2370_s2 = inlined_call_operand.vmem [shape: f32[16,8], index: 2, kind: input, shape index: {}]   ;;  %s2371_s3 = inlined_call_operand.vmem [shape: f32[4,16], index: 3, kind: input, shape index: {}]   ;;  %s2372_s4 = inlined_call_operand.vmem [shape: f32[16,4], index: 4, kind: input, shape index: {}]   ;;  %s2373_s5 = inlined_call_operand.hbm [shape: f32[2,4,8,8], index: 5, kind: output, shape index: {0}]   ;;  %s2374_s6 = inlined_call_operand.hbm [shape: f32[2,4,4,4], index: 6, kind: output, shape index: {1}]  }
   0x1   :  { %14 = vsyncpa [#allocation3 + $0x1], 0 }
   0x2   :  { %15 = vsyncpa [#allocation4], 0 }
   0x3   :  { %17 = vsyncpa [#allocation4 + $0x1], 0 }
   0x4   :  { %18 = vsyncpa [#allocation7], 0 }
   0x5   :  { %20 = vsyncpa [#allocation7 + $0x1], 0  ;;  %s2057_s21 = smov 0   ;;  %s2059_s22 = smov 0  }
   0x6   :  { %s2061_s23 = smov 0   ;;  %s2063_s24 = smov 0  }
   0x7 LB: > { %s2078_s25 = sadd.s32 4294967295, %s2009_s24   ;;  %s1613_s26 = sadd.s32 4294967294, %s2009_s24   ;;  %s2009_s24 = sphi %s2063_s24, %s2389_s24   ;;  %s2005_s23 = sphi %s2061_s23, %s2388_s23   ;;  %s2001_s22 = sphi %s2059_s22, %s2387_s22   ;;  %s1997_s21 = sphi %s2057_s21, %s2386_s21  }
   0x8   : > { %s2082_s27 = sadd.s32 1, %s2009_s24   ;;  %s33_s28 = sadd.s32 1, %s2005_s23 }
   0x9   : > { %s30_s29 = ssub.s32 %s2009_s24, %s2082_s27  ;;  %p40_p0 = scmp.ne.s32.totalorder %s2005_s23, %s2001_s22 }
   0xa   : > { %p31_p1 = scmp.eq.s32.totalorder %s30_s29, 0  ;;  %p41_p2 = scmp.eq.s32.totalorder %s2009_s24, 0 }
   0xb   : > { %p46_p3 = scmp.ne.s32.totalorder %s2001_s22, %s1997_s21  ;;  %p47_p4 = scmp.eq.s32.totalorder %s2078_s25, 0 }
   0xc   : > { %s2094_s30 = scalar_select %p31_p1, %s2005_s23, %s33_s28  }
   0xd   : > { %p2096_p5 = por %p41_p2, %p40_p0  ;;  %p2100_p6 = por %p47_p4, %p46_p3 }
   0xe   : > { %p154_p7 = scmp.eq.s32.totalorder %s2078_s25, 1  ;;  %p160_p8 = scmp.eq.s32.totalorder %s1613_s26, 1 }
   0xf   : > { %s2378_s8 = scalar_select %p2100_p6, 1, 0 }
  0x10   : > { %p1845_p10 = scmp.lt.s32.totalorder %s2009_s24, 2  ;;  %p2107_p11 = por %p154_p7, %p40_p0 }
  0x11   : > { %p2111_p12 = por %p160_p8, %p46_p3  ;;  %s218_s11 = sand.u32 1, %s2005_s23  }
  0x12   : > { %s2379_s9 = scalar_select %p2107_p11, 1, 0 }
  0x13   : > { %s2380_s10 = scalar_select %p2111_p12, 1, 0 }
  0x14   : > { %s1665_s12 = sshll.u32 %s2009_s24, 10  ;;  %s1616_s13 = sshll.u32 %s218_s11, 6 }
  0x15   : > { %s2120_s16 = scalar_lea.hbm %s2368_s0, %s1665_s12  ;;  %s222_s17 = scalar_lea.vmem [#allocation2], %s1616_s13 }
  0x16   : > { %s229_s18 = sshll.u32 %s222_s17, 4  ;;  %p2124_p13 = pnand %p1845_p10, %p2096_p5  ;;  %s2128_s18 = int_to_ptr.vmem [resolvable:$true] %s229_s18 }
  0x17   : > { %s2130_s20 = scalar_lea.sflag [#allocation3], %s218_s11  ;;  %s1887_s26 = scalar_lea.hbm %s2120_s16, 1024 }
  0x18   : > { %p1888_p0 = scmp.ne.s32.totalorder %s2120_s16, %s1887_s26  ;;  %p1889_p1 = pneg %p2124_p13 }
  0x19   : > { %s1892_s12 = scalar_lea.hbm %s2368_s0, 2048  ;;  %p1893_p4 = scmp.lt.s32.totalorder %s2120_s16, %s2368_s0 }
  0x1a   : > { %p1890_p2 = pnand %p1889_p1, %p1888_p0  ;;  %p1894_p5 = scmp.lt.s32.totalorder %s1892_s12, %s1887_s26 }
  0x1c   : > { %p1891_p3 = pneg %p1890_p2  ;;  %p1895_p7 = por %p1894_p5, %p1893_p4 }
  0x1e   : > { %p1896_p8 = pnand %p1895_p7, %p1891_p3 }
  0x20   : > { %1899 = shalt.err (!%p1896_p8)
}
  0x21   : > { %s1900_s11 = scalar_lea.vmem %s2128_s18, 1024  ;;  %s2011_s14 = smov [#allocation2]  }
  0x22   : > { %p1901_p10 = scmp.ne.s32.totalorder %s2128_s18, %s1900_s11  ;;  %s1905_s15 = sshll.u32 %s2011_s14, 4  ;;  %s1906_s15 = int_to_ptr.vmem [resolvable:$false] %s1905_s15 }
  0x23   : > { %s1907_s17 = scalar_lea.vmem %s1906_s15, 2048  ;;  %p1908_p2 = scmp.lt.s32.totalorder %s2128_s18, %s1906_s15 }
  0x24   : > { %p1903_p9 = pnand %p1901_p10, %p1889_p1  ;;  %p1909_p12 = scmp.lt.s32.totalorder %s1907_s17, %s1900_s11 }
  0x26   : > { %p1904_p0 = pneg %p1903_p9  ;;  %p1910_p11 = por %p1909_p12, %p1908_p2 }
  0x28   : > { %p1911_p6 = pnand %p1910_p11, %p1904_p0 }
  0x2a   : > { %1914 = shalt.err (!%p1911_p6)
}
  0x2b   : > { %s2012_s26 = smov 128   ;;  %s2013_s28 = smov 8  }
  0x2c   : > { %1837 = dma.hbm_to_vmem [thread:$0]  (!%p2124_p13), %s2120_s16, 1024, %s2128_s18, %s2130_s20, %s2012_s26, %s2012_s26, %s2013_s28  }
  0x2d   : > { %p1619_p9 = scmp.ge.s32.totalorder %s2009_s24, 1  ;;  %p237_p1 = scmp.lt.s32.totalorder %s2009_s24, 3 }
  0x2f   : > { %p238_p3 = pnand %p1619_p9, %p237_p1 }
  0x30   : > { %s2154_s29 = sand.u32 (!%p238_p3), 1, %s2001_s22   ;;  %p2382_p6 = scmp.ne.s32.totalorder (!%p238_p3), %s2378_s8, 0 }
  0x31   : > { %241 = sbr.rel (%p238_p3) target bundleno = 500 (0x1f4), region = 40  ;;  %s1620_s12 = sshll.u32 (!%p238_p3), %s2154_s29, 6 }
  0x32   : > { %s244_s7 = scalar_lea.sflag (!%p238_p3), [#allocation3], %s2154_s29  ;;  %s2158_s13 = scalar_lea.vmem (!%p238_p3), [#allocation2], %s1620_s12 }
  0x36   : > { %1984 = dma.done.wait (%p2382_p6), %s244_s7, 1024  }
  0x37   : > { %1986 = vsyncadd (%p2382_p6), %s244_s7, 4294966272  ;;  %v2014_v0 = vmov 0.0   ;;  %vm2015_vm0 = vmmov 0   ;;  %v285_v1 = vld [vmem:[%s2158_s13 + $0x8] sm:$0xff]  ;;  %v284_v2 = vld [vmem:[%s2158_s13] sm:$0xff]  ;;  %vm286_vm1 = vcmask 130048  }
  0x38   : > { %1716 = vmatprep.subr.mxu0 %v2014_v0  ;;  %1720 = vmatprep.mubr.msk.f32.mxu0 %vm2015_vm0, %v2014_v0  ;;  %v281_v3 = vld [vmem:[%s2369_s1] sm:$0xff]  ;;  %v1626_v4 = vld [vmem:[%s2158_s13 + $0x18] sm:$0xff]  ;;  %v2180_v5 = vld [vmem:[%s2370_s2 + $0x8] sm:$0xff]  ;;  %s1621_s7 = sshll.u32 %s2154_s29, 5  ;;  %vm433_vm2 = vcmask 64512   ;;  %s1666_s16 = sshll.u32 %s2078_s25, 9 }
  0x39   : > { %1723 = vmatprep.subr.mxu1 %v2014_v0  ;;  %1727 = vmatprep.mubr.msk.f32.mxu1 %vm2015_vm0, %v2014_v0  ;;  %v1625_v6 = vld [vmem:[%s2158_s13 + $0x10] sm:$0xff]  ;;  %v1631_v7 = vld [vmem:[%s2158_s13 + $0x28] sm:$0xff]  ;;  %v1630_v8 = vld [vmem:[%s2158_s13 + $0x20] sm:$0xff]  ;;  %s1622_s18 = sshll.u32 %s2154_s29, 4  ;;  %s2287_s11 = scalar_lea.hbm %s2373_s5, %s1666_s16  ;;  %vm1030_vm3 = vcmask 27648  }
  0x3a   : > { %1717 = vmatpush3.msra.mxu0 %v285_v1  ;;  %1724 = vmatpush3.msra.mxu1 %v2180_v5  ;;  %v1636_v9 = vld [vmem:[%s2158_s13 + $0x38] sm:$0xff]  ;;  %v1635_v10 = vld [vmem:[%s2158_s13 + $0x30] sm:$0xff]  ;;  %v879_v11 = vld [vmem:[%s2371_s3] sm:$0xf]  ;;  %s273_s13 = scalar_lea.vmem [#allocation5], %s1621_s7  ;;  %s1474_s14 = scalar_lea.sflag [#allocation4], %s2154_s29 }
  0x3b   : > { %1718 = vmatprep.subr.mxu0 %v2014_v0  ;;  %1725 = vmatprep.subr.mxu1 %v2014_v0  ;;  %v282_v12 = vld [vmem:[%s2370_s2] sm:$0xff]  ;;  %v881_v19 = vld [vmem:[%s2372_s4 + $0x8] sm:$0xff]  ;;  %s1492_s8 = sshll.u32 %s273_s13, 4  ;;  %p2383_p12 = scmp.ne.s32.totalorder %s2379_s9, 0  ;;  %s2280_s8 = int_to_ptr.vmem [resolvable:$true] %s1492_s8 }
  0x3c   : > { %1719 = vmatpush3.msra.mxu0 %v284_v2  ;;  %1726 = vmatpush3.msra.mxu1 %v282_v12  ;;  %v880_v21 = vld [vmem:[%s2372_s4] sm:$0xff]  ;;  %s1915_s15 = scalar_lea.vmem %s2280_s8, 512  ;;  %s2016_s17 = smov [#allocation5]  }
  0x3d   : > { %1721 = vmatmul.mubr.msk.f32.vlgmr.msra.gmra.mxu0 %vm286_vm1, %v281_v3  ;;  %1730 = vmatprep.subr.mxu0 %v2014_v0  ;;  %p1916_p11 = scmp.ne.s32.totalorder %s2280_s8, %s1915_s15  ;;  %s1919_s26 = sshll.u32 %s2016_s17, 4  ;;  %s1920_s26 = int_to_ptr.vmem [resolvable:$false] %s1919_s26 }
  0x3e   : > { %1731 = vmatpush3.msra.mxu0 %v1626_v4  ;;  %1734 = vmatprep.mubr.msk.f32.mxu0 %vm2015_vm0, %v2014_v0  ;;  %s1921_s28 = scalar_lea.vmem %s1920_s26, 1024  ;;  %p1922_p5 = scmp.lt.s32.totalorder %s2280_s8, %s1920_s26 }
  0x3f   : > { %1732 = vmatprep.subr.mxu0 %v2014_v0  ;;  %1737 = vmatprep.subr.mxu1 %v2014_v0  ;;  %p1917_p13 = pnand %p1916_p11, %p2383_p12  ;;  %p1923_p7 = scmp.lt.s32.totalorder %s1921_s28, %s1915_s15 }
  0x40   : > { %1733 = vmatpush3.msra.mxu0 %v1625_v6 }
  0x41   : > { %1735 = vmatmul.mubr.msk.f32.vlgmr.msra.gmra.mxu0 %vm286_vm1, %v281_v3  ;;  %1744 = vmatprep.subr.mxu0 %v2014_v0  ;;  %p1918_p4 = pneg %p1917_p13  ;;  %p1924_p8 = por %p1923_p7, %p1922_p5 }
  0x42   : > { %1745 = vmatpush3.msra.mxu0 %v1631_v7  ;;  %1748 = vmatprep.mubr.msk.f32.mxu0 %vm2015_vm0, %v2014_v0 }
  0x43   : > { %1746 = vmatprep.subr.mxu0 %v2014_v0  ;;  %p1925_p10 = pnand %p1924_p8, %p1918_p4 }
  0x44   : > { %1747 = vmatpush3.msra.mxu0 %v1630_v8 }
  0x45   : > { %1749 = vmatmul.mubr.msk.f32.vlgmr.msra.gmra.mxu0 %vm286_vm1, %v281_v3  ;;  %1758 = vmatprep.subr.mxu0 %v2014_v0 }
  0x46   : > { %1759 = vmatpush3.msra.mxu0 %v1636_v9  ;;  %1762 = vmatprep.mubr.msk.f32.mxu0 %vm2015_vm0, %v2014_v0 }
  0x47   : > { %1760 = vmatprep.subr.mxu0 %v2014_v0 }
  0x48   : > { %1761 = vmatpush3.msra.mxu0 %v1635_v10 }
  0x49   : > { %1763 = vmatmul.mubr.msk.f32.vlgmr.msra.gmra.mxu0 %vm286_vm1, %v281_v3  ;;  %1772 = vmatprep.subr.mxu0 %v2014_v0 }
  0x4a   : > { %1773 = vmatpush3.msra.mxu0 %v285_v1  ;;  %1776 = vmatprep.mubr.msk.f32.mxu0 %vm2015_vm0, %v2014_v0 }
  0x4b   : > { %1774 = vmatprep.subr.mxu0 %v2014_v0 }
  0x4c   : > { %1775 = vmatpush3.msra.mxu0 %v284_v2 }
  0x4d   : > { %1777 = vmatmul.mubr.msk.f32.vlgmr.msra.gmra.mxu0 %vm286_vm1, %v879_v11  ;;  %1786 = vmatprep.subr.mxu0 %v2014_v0 }
  0x4e   : > { %1787 = vmatpush3.msra.mxu0 %v1626_v4  ;;  %1790 = vmatprep.mubr.msk.f32.mxu0 %vm2015_vm0, %v2014_v0 }
  0x4f   : > { %1788 = vmatprep.subr.mxu0 %v2014_v0 }
  0x50   : > { %1789 = vmatpush3.msra.mxu0 %v1625_v6 }
  0x51   : > { %1791 = vmatmul.mubr.msk.f32.vlgmr.msra.gmra.mxu0 %vm286_vm1, %v879_v11  ;;  %1800 = vmatprep.subr.mxu0 %v2014_v0 }
  0x52   : > { %1801 = vmatpush3.msra.mxu0 %v1631_v7  ;;  %1804 = vmatprep.mubr.msk.f32.mxu0 %vm2015_vm0, %v2014_v0 }
  0x53   : > { %1802 = vmatprep.subr.mxu0 %v2014_v0 }
  0x54   : > { %1803 = vmatpush3.msra.mxu0 %v1630_v8 }
  0x55   : > { %1805 = vmatmul.mubr.msk.f32.vlgmr.msra.gmra.mxu0 %vm286_vm1, %v879_v11  ;;  %1814 = vmatprep.subr.mxu0 %v2014_v0 }
  0x56   : > { %1815 = vmatpush3.msra.mxu0 %v1636_v9  ;;  %1818 = vmatprep.mubr.msk.f32.mxu0 %vm2015_vm0, %v2014_v0 }
  0x57   : > { %1816 = vmatprep.subr.mxu0 %v2014_v0 }
  0x58   : > { %1817 = vmatpush3.msra.mxu0 %v1635_v10 }
  0x59   : > { %1819 = vmatmul.mubr.msk.f32.vlgmr.msra.gmra.mxu0 %vm286_vm1, %v879_v11 }
  0xfd   : > { %v356_v13 = vpop.f32.mrf.mxu0 }
  0xfe   : > { %1728 = vmatmul.mubr.msk.f32.vlgmr.msra.gmra.mxu1 %vm286_vm1, %v356_v13 }
  0xff   : > { %v1722_v14 = vpop.f32.mrf.mxu0  ;;  %1738 = vmatpush3.msra.mxu1 %v2180_v5  ;;  %1741 = vmatprep.mubr.msk.f32.mxu1 %vm2015_vm0, %v2014_v0 }
 0x100   : > { %1739 = vmatprep.subr.mxu1 %v2014_v0 }
 0x101   : > { %v504_v15 = vpop.f32.mrf.mxu0  ;;  %1740 = vmatpush3.msra.mxu1 %v282_v12 }
 0x102   : > { %1742 = vmatmul.mubr.msk.f32.vlgmr.msra.gmra.mxu1 %vm286_vm1, %v504_v15  ;;  %1751 = vmatprep.subr.mxu1 %v2014_v0 }
 0x103   : > { %v1736_v16 = vpop.f32.mrf.mxu0  ;;  %1752 = vmatpush3.msra.mxu1 %v2180_v5  ;;  %1755 = vmatprep.mubr.msk.f32.mxu1 %vm2015_vm0, %v2014_v0 }
 0x104   : > { %1753 = vmatprep.subr.mxu1 %v2014_v0 }
 0x105   : > { %v652_v17 = vpop.f32.mrf.mxu0  ;;  %1754 = vmatpush3.msra.mxu1 %v282_v12 }
 0x106   : > { %1756 = vmatmul.mubr.msk.f32.vlgmr.msra.gmra.mxu1 %vm286_vm1, %v652_v17  ;;  %1765 = vmatprep.subr.mxu1 %v2014_v0 }
 0x107   : > { %v1750_v18 = vpop.f32.mrf.mxu0  ;;  %1766 = vmatpush3.msra.mxu1 %v2180_v5  ;;  %1769 = vmatprep.mubr.msk.f32.mxu1 %vm2015_vm0, %v2014_v0 }
 0x108   : > { %1767 = vmatprep.subr.mxu1 %v2014_v0 }
 0x109   : > { %v800_v20 = vpop.f32.mrf.mxu0  ;;  %1768 = vmatpush3.msra.mxu1 %v282_v12 }
 0x10a   : > { %1770 = vmatmul.mubr.msk.f32.vlgmr.msra.gmra.mxu1 %vm286_vm1, %v800_v20  ;;  %1779 = vmatprep.subr.mxu1 %v2014_v0 }
 0x10b   : > { %v1764_v22 = vpop.f32.mrf.mxu0  ;;  %1780 = vmatpush3.msra.mxu1 %v881_v19  ;;  %1783 = vmatprep.mubr.msk.f32.mxu1 %vm2015_vm0, %v2014_v0 }
 0x10c   : > { %1781 = vmatprep.subr.mxu1 %v2014_v0 }
 0x10d   : > { %v953_v23 = vpop.f32.mrf.mxu0  ;;  %1782 = vmatpush3.msra.mxu1 %v880_v21 }
 0x10e   : > { %1784 = vmatmul.mubr.msk.f32.vlgmr.msra.gmra.mxu1 %vm286_vm1, %v953_v23  ;;  %1793 = vmatprep.subr.mxu1 %v2014_v0 }
 0x10f   : > { %v1778_v24 = vpop.f32.mrf.mxu0  ;;  %1794 = vmatpush3.msra.mxu1 %v881_v19  ;;  %1797 = vmatprep.mubr.msk.f32.mxu1 %vm2015_vm0, %v2014_v0 }
 0x110   : > { %1795 = vmatprep.subr.mxu1 %v2014_v0 }
 0x111   : > { %v1100_v25 = vpop.f32.mrf.mxu0  ;;  %1796 = vmatpush3.msra.mxu1 %v880_v21 }
 0x112   : > { %1798 = vmatmul.mubr.msk.f32.vlgmr.msra.gmra.mxu1 %vm286_vm1, %v1100_v25  ;;  %1807 = vmatprep.subr.mxu1 %v2014_v0 }
 0x113   : > { %v1792_v26 = vpop.f32.mrf.mxu0  ;;  %1808 = vmatpush3.msra.mxu1 %v881_v19  ;;  %1811 = vmatprep.mubr.msk.f32.mxu1 %vm2015_vm0, %v2014_v0 }
 0x114   : > { %1809 = vmatprep.subr.mxu1 %v2014_v0 }
 0x115   : > { %v1247_v27 = vpop.f32.mrf.mxu0  ;;  %1810 = vmatpush3.msra.mxu1 %v880_v21 }
 0x116   : > { %1812 = vmatmul.mubr.msk.f32.vlgmr.msra.gmra.mxu1 %vm286_vm1, %v1247_v27  ;;  %1821 = vmatprep.subr.mxu1 %v2014_v0 }
 0x117   : > { %v1806_v28 = vpop.f32.mrf.mxu0  ;;  %1822 = vmatpush3.msra.mxu1 %v881_v19  ;;  %1825 = vmatprep.mubr.msk.f32.mxu1 %vm2015_vm0, %v2014_v0 }
 0x118   : > { %1823 = vmatprep.subr.mxu1 %v2014_v0 }
 0x119   : > { %v1394_v29 = vpop.f32.mrf.mxu0  ;;  %1824 = vmatpush3.msra.mxu1 %v880_v21 }
 0x11a   : > { %1826 = vmatmul.mubr.msk.f32.vlgmr.msra.gmra.mxu1 %vm286_vm1, %v1394_v29 }
 0x11b   : > { %v1820_v30 = vpop.f32.mrf.mxu0 }
 0x1be   : > { %v429_v31 = vpop.f32.mrf.mxu1 }
 0x1bf   : > { %434 = vst.msk [vmem:[%s273_s13] sm:$0xff] %vm433_vm2, %v429_v31 }
 0x1c0   : > { %v1729_v32 = vpop.f32.mrf.mxu1 }
 0x1c2   : > { %v577_v33 = vpop.f32.mrf.mxu1 }
 0x1c3   : > { %1629 = vst.msk [vmem:[%s273_s13 + $0x8] sm:$0xff] %vm433_vm2, %v577_v33 }
 0x1c4   : > { %v1743_v34 = vpop.f32.mrf.mxu1 }
 0x1c6   : > { %v725_v35 = vpop.f32.mrf.mxu1 }
 0x1c7   : > { %1634 = vst.msk [vmem:[%s273_s13 + $0x10] sm:$0xff] %vm433_vm2, %v725_v35 }
 0x1c8   : > { %v1757_v36 = vpop.f32.mrf.mxu1 }
 0x1ca   : > { %v873_v37 = vpop.f32.mrf.mxu1 }
 0x1cb   : > { %1639 = vst.msk [vmem:[%s273_s13 + $0x18] sm:$0xff] %vm433_vm2, %v873_v37 }
 0x1cc   : > { %v1771_v38 = vpop.f32.mrf.mxu1 }
 0x1cd   : > { %1928 = shalt.err (!%p1925_p10)
}
 0x1ce   : > { %s1929_s12 = scalar_lea.hbm %s2287_s11, 512  ;;  %s1933_s16 = scalar_lea.hbm %s2373_s5, 1024 }
 0x1cf   : > { %p1930_p0 = scmp.ne.s32.totalorder %s2287_s11, %s1929_s12  ;;  %p1934_p1 = scmp.lt.s32.totalorder %s2287_s11, %s2373_s5 }
 0x1d0   : > { %p1935_p3 = scmp.lt.s32.totalorder %s1933_s16, %s1929_s12 }
 0x1d1   : > { %p1931_p2 = pnand %p1930_p0, %p2383_p12 }
 0x1d2   : > { %p1936_p6 = por %p1935_p3, %p1934_p1 }
 0x1d3   : > { %p1932_p9 = pneg %p1931_p2 }
 0x1d5   : > { %p1937_p11 = pnand %p1936_p6, %p1932_p9 }
 0x1d7   : > { %1940 = shalt.err (!%p1937_p11)
}
 0x1d8   : > { %s2017_s15 = smov 128   ;;  %s2018_s17 = smov 8   ;;  %v1026_v39 = vpop.f32.mrf.mxu1 }
 0x1d9   : > { %1830 = dma.vmem_to_hbm [thread:$0]  (%p2383_p12), %s2280_s8, 512, %s2287_s11, %s1474_s14, %s2017_s15, %s2017_s15, %s2018_s17  }
 0x1da   : > { %s280_s26 = scalar_lea.vmem [#allocation6], %s1622_s18  ;;  %v1785_v40 = vpop.f32.mrf.mxu1  ;;  %s1667_s12 = sshll.u32 %s2078_s25, 8 }
 0x1db   : > { %1031 = vst.msk [vmem:[%s280_s26] sm:$0xf] %vm1030_vm3, %v1026_v39  ;;  %s1508_s28 = sshll.u32 %s280_s26, 4  ;;  %s2324_s11 = scalar_lea.hbm %s2374_s6, %s1667_s12  ;;  %s2318_s28 = int_to_ptr.vmem [resolvable:$true] %s1508_s28 }
 0x1dc   : > { %v1173_v41 = vpop.f32.mrf.mxu1  ;;  %s1479_s14 = scalar_lea.sflag [#allocation7], %s2154_s29  ;;  %s1941_s25 = scalar_lea.vmem %s2318_s28, 256 }
 0x1dd   : > { %1646 = vst.msk [vmem:[%s280_s26 + $0x4] sm:$0xf] %vm1030_vm3, %v1173_v41  ;;  %p1942_p13 = scmp.ne.s32.totalorder %s2318_s28, %s1941_s25  ;;  %s2019_s7 = smov [#allocation6]  }
 0x1de   : > { %v1799_v42 = vpop.f32.mrf.mxu1  ;;  %s1945_s13 = sshll.u32 %s2019_s7, 4  ;;  %s1946_s13 = int_to_ptr.vmem [resolvable:$false] %s1945_s13 }
 0x1df   : > { %p1943_p4 = pnand %p1942_p13, %p2383_p12  ;;  %s1947_s16 = scalar_lea.vmem %s1946_s13, 512 }
 0x1e0   : > { %v1320_v43 = vpop.f32.mrf.mxu1  ;;  %p1948_p7 = scmp.lt.s32.totalorder %s2318_s28, %s1946_s13  ;;  %p1949_p8 = scmp.lt.s32.totalorder %s1947_s16, %s1941_s25 }
 0x1e1   : > { %1651 = vst.msk [vmem:[%s280_s26 + $0x8] sm:$0xf] %vm1030_vm3, %v1320_v43  ;;  %p1944_p5 = pneg %p1943_p4 }
 0x1e2   : > { %v1813_v44 = vpop.f32.mrf.mxu1  ;;  %p1950_p10 = por %p1949_p8, %p1948_p7 }
 0x1e4   : > { %v1467_v45 = vpop.f32.mrf.mxu1  ;;  %p1951_p0 = pnand %p1950_p10, %p1944_p5 }
 0x1e5   : > { %1656 = vst.msk [vmem:[%s280_s26 + $0xc] sm:$0xf] %vm1030_vm3, %v1467_v45 }
 0x1e6   : > { %v1827_v46 = vpop.f32.mrf.mxu1 }
 0x1e7   : > { %1954 = shalt.err (!%p1951_p0)
}
 0x1e8   : > { %s1955_s19 = scalar_lea.hbm %s2324_s11, 256  ;;  %s1959_s17 = scalar_lea.hbm %s2374_s6, 512 }
 0x1e9   : > { %p1956_p2 = scmp.ne.s32.totalorder %s2324_s11, %s1955_s19  ;;  %p1960_p3 = scmp.lt.s32.totalorder %s2324_s11, %s2374_s6 }
 0x1ea   : > { %p1961_p6 = scmp.lt.s32.totalorder %s1959_s17, %s1955_s19 }
 0x1eb   : > { %p1957_p9 = pnand %p1956_p2, %p2383_p12 }
 0x1ec   : > { %p1962_p11 = por %p1961_p6, %p1960_p3 }
 0x1ed   : > { %p1958_p1 = pneg %p1957_p9 }
 0x1ef   : > { %p1963_p13 = pnand %p1962_p11, %p1958_p1 }
 0x1f1   : > { %1966 = shalt.err (!%p1963_p13)
}
 0x1f2   : > { %s2020_s8 = smov 64   ;;  %s2021_s18 = smov 4  }
 0x1f3   : > { %1831 = dma.vmem_to_hbm [thread:$0]  (%p2383_p12), %s2318_s28, 256, %s2324_s11, %s1479_s14, %s2020_s8, %s2020_s8, %s2021_s18  }
 0x1f4 PF: > { %s1523_s25 = sand.u32 1, %s1997_s21   ;;  %p2384_p4 = scmp.ne.s32.totalorder %s2380_s10, 0 }
 0x1f5   : > { %p2385_p5 = scmp.ge.s32.totalorder %s2009_s24, 2  ;;  %s1524_s7 = scalar_lea.sflag [#allocation4], %s1523_s25 }
 0x1f7   : > { %p1839_p7 = pnand %p2385_p5, %p2384_p4 }
 0x1f9   : > { %p1840_p8 = pneg %p1839_p7 }
 0x1fb   : > { %1988 = dma.done.wait (%p1840_p8), %s1524_s7, 512  }
 0x1fc   : > { %1990 = vsyncadd (%p1840_p8), %s1524_s7, 4294966784  ;;  %s1533_s13 = scalar_lea.sflag [#allocation7], %s1523_s25 }
 0x1fd   : > { %1992 = dma.done.wait (%p1840_p8), %s1533_s13, 256  }
 0x1fe   : > { %1994 = vsyncadd (%p1840_p8), %s1533_s13, 4294967040  ;;  %p23_p12 = scmp.ge.s32.totalorder %s2082_s27, 4   ;;  %s2386_s21 = smov %s2001_s22 }
 0x1ff   : > { %s2387_s22 = smov %s2005_s23  ;;  %s2388_s23 = smov %s2094_s30 }
 0x200   : > { %s2389_s24 = smov %s2082_s27  ;;  %25 = sbr.rel (!%p23_p12) target bundleno = 7 (0x7), region = 111 }
 0x205   :  { %1538 = vsyncpa [#allocation3], 1 }
 0x206   :  { %1540 = vsyncpa [#allocation3 + $0x1], 1 }
 0x207   :  { %1541 = vsyncpa [#allocation4], 1 }
 0x208   :  { %1543 = vsyncpa [#allocation4 + $0x1], 1 }
 0x209   :  { %1544 = vsyncpa [#allocation7], 1 }
 0x20a   :  { %1546 = vsyncpa [#allocation7 + $0x1], 1 }

</bundles_post_ra>
